<compile_context>
chip_gen: v5e
topology: v5e:2x2
jax: 0.10.0
libtpu: 0.0.40
codegen_flags: <defaults>
</compile_context>

<pallas_src>
import functools

import jax
import jax.numpy as jnp
from jax import lax
from jax.experimental import pallas as pl
from jax.experimental.pallas import tpu as pltpu


def _rouge_kernel(s_total, logits_ref, labels_ref, out_ref,
                  onehot_sc, a_sc, h_sc, c_sc, n_sc):
    # logits_ref: (1, TS, V)  native dtype -- one S-tile of one batch element
    # labels_ref: (1, 1, L)   int32
    # out_ref:    (1, 1, 128) f32 -- per-batch numerator broadcast across lanes
    # onehot_sc:  (V, L)      logits dtype -- one-hot(labels), built at k == 0
    # a/h/c/n_sc: (1, L)      f32 streaming accumulators (see module docstring)
    k = pl.program_id(1)

    x = logits_ref[0]                              # (TS, V) native dtype
    lab = labels_ref[0]                            # (1, L)  int32
    TS, V = x.shape
    L = lab.shape[1]

    # ---- per-batch-element init: hoisted one-hot + zeroed accumulators ----
    @pl.when(k == 0)
    def _():
        v_col = lax.broadcasted_iota(jnp.int32, (V, L), 0)
        onehot_sc[...] = (v_col == lab).astype(onehot_sc.dtype)
        a_sc[...] = jnp.zeros_like(a_sc)
        h_sc[...] = jnp.zeros_like(h_sc)
        c_sc[...] = jnp.zeros_like(c_sc)
        n_sc[...] = jnp.zeros_like(n_sc)

    # ---- logsumexp over vocab (f32 for numerical fidelity) ----
    # TODO(synk): a bf16 EUP exp path on v6e/v7x would ~double exp throughput
    # at ~1e-2 relative lse error; kept f32 for fidelity (and v5e has no bf16 EUP).
    xf = x.astype(jnp.float32)                                        # (TS, V)
    m = jnp.max(xf, axis=-1, keepdims=True)                           # (TS, 1)
    lse = m + jnp.log(jnp.sum(jnp.exp(xf - m), axis=-1, keepdims=True))

    onehot = onehot_sc[...]                                           # (V, L)

    # ---- gathered logit[s,l] = logits[s, labels[l]] via one-hot MXU matmul --
    gathered = lax.dot_general(x, onehot, (((1,), (0,)), ((), ())),
                               preferred_element_type=jnp.float32)    # (TS, L)
    lp_tile = gathered - lse                     # log softmax prob at label cols

    # ---- hit[s,l] = (labels[l] attains the row max): exact 0/1 matmul ----
    ismax = (xf == m).astype(onehot.dtype)                            # (TS, V)
    hits = lax.dot_general(ismax, onehot, (((1,), (0,)), ((), ())),
                           preferred_element_type=jnp.float32)        # (TS, L)
    ov_tile = (hits > 0.5).astype(jnp.float32)

    # ---- mask rows past the true sequence length (S padded to a tile mult) --
    if s_total % TS != 0:
        row = k * TS + lax.broadcasted_iota(jnp.int32, (TS, 1), 0)
        valid = (row < s_total).astype(jnp.float32)                   # (TS, 1)
        lp_tile = lp_tile * valid
        ov_tile = ov_tile * valid

    # ---- streaming accumulators (all O(L)) ----
    per_s = jnp.sum(ov_tile, axis=-1, keepdims=True)                  # (TS, 1)
    row_nohit = (per_s == 0.0).astype(jnp.float32)                    # (TS, 1)

    a_sc[...] += jnp.sum(lp_tile, axis=0, keepdims=True)
    h_sc[...] += jnp.sum(ov_tile * lp_tile, axis=0, keepdims=True)
    c_sc[...] += jnp.sum(row_nohit * lp_tile, axis=0, keepdims=True)
    n_sc[...] += jnp.sum(ov_tile, axis=0, keepdims=True)

    # ---- finalize on the last S tile ----
    @pl.when(k == pl.num_programs(1) - 1)
    def _():
        col_nohit = (n_sc[...] == 0.0).astype(jnp.float32)            # (1, L)
        total = (0.1 * jnp.sum(a_sc[...])
                 + 0.9 * jnp.sum(h_sc[...])
                 + 0.4 * jnp.sum(col_nohit * c_sc[...]))
        numer = -2.0 * total
        out_ref[...] = jnp.broadcast_to(numer, out_ref.shape).astype(out_ref.dtype)


_VMEM_CAP_CACHE = [None]


def _vmem_capacity_bytes():
    if _VMEM_CAP_CACHE[0] is None:
        try:
            _VMEM_CAP_CACHE[0] = int(pltpu.get_tpu_info().vmem_capacity_bytes)
        except Exception:
            _VMEM_CAP_CACHE[0] = 64 * 1024 * 1024   # conservative (v7x-sized) fallback
    return _VMEM_CAP_CACHE[0]


def _sublane_granularity(itemsize):
    if itemsize >= 4:
        return 8
    if itemsize == 2:
        return 16
    return 32


def _choose_s_tile(S, V, L, itemsize, vmem_limit_bytes):
    """Largest S-tile whose *true* working set fits the scoped-VMEM budget.

    Per streamed S-row:  2 x native logits (double-buffered input DMA)
                         + ~2 x f32 (TS,V) temporaries (upcast + exp).
    Fixed overheads: hoisted (V,L) one-hot scratch + O(L) accumulators.
    """
    gran = _sublane_granularity(itemsize)
    per_row = V * (2 * itemsize + 8)
    budget = int(0.6 * vmem_limit_bytes) - V * L * itemsize - (1 << 20)
    budget = max(budget, gran * per_row)          # always allow a minimal tile
    max_ts = max(gran, (budget // per_row) // gran * gran)
    s_ceil = -(-S // gran) * gran
    return min(s_ceil, max_ts)


@functools.partial(jax.jit, static_argnames=("n", "reduction", "s_tile"))
def rouge_loss(logits, labels, n=1, reduction="mean", s_tile=None):
    if reduction != "mean":
        # TODO(synk): reduction != 'mean' returns the overlap tensor in the
        # reference; not produced by this numerator-only kernel.
        raise NotImplementedError("only reduction='mean' is implemented")

    B, S, V = logits.shape
    L = labels.shape[1]
    labels3 = labels.astype(jnp.int32).reshape(B, 1, L)

    itemsize = jnp.dtype(logits.dtype).itemsize
    gran = _sublane_granularity(itemsize)

    # Generation-aware scoped-VMEM budget: ~48 MiB on v7x (64 MiB physical),
    # ~96 MiB on v5e/v6e (128 MiB physical).
    vmem_limit = min(_vmem_capacity_bytes() * 3 // 4, 100 * 1024 * 1024)

    if s_tile is not None:
        ts = max(gran, (int(s_tile) // gran) * gran)
    else:
        ts = _choose_s_tile(S, V, L, itemsize, vmem_limit)

    # Pad S up to a tile multiple (masked in-kernel) instead of widening the
    # tile to the full (possibly VMEM-busting) sequence length.
    s_pad = -(-S // ts) * ts
    if s_pad != S:
        logits = jnp.pad(logits, ((0, 0), (0, s_pad - S), (0, 0)))
    k_tiles = s_pad // ts

    kernel = functools.partial(_rouge_kernel, S)

    # TODO(synk): on v7x with B < 2, split the S-tile range across the two
    # TensorCores (extra parallel grid axis + partial-accumulator combine).
    # TODO(synk): on v5e (HBM-bound) a pipeline_mode=pl.Buffered(3) logits spec
    # could smooth DMA jitter; omitted to keep one code path.
    numer_raw = pl.pallas_call(
        kernel,
        out_shape=jax.ShapeDtypeStruct((B, 1, 128), jnp.float32),
        grid_spec=pltpu.PrefetchScalarGridSpec(
            num_scalar_prefetch=0,
            grid=(B, k_tiles),
            in_specs=[
                pl.BlockSpec((1, ts, V), lambda b, k: (b, k, 0)),
                pl.BlockSpec((1, 1, L), lambda b, k: (b, 0, 0)),
            ],
            out_specs=pl.BlockSpec((1, 1, 128), lambda b, k: (b, 0, 0)),
            scratch_shapes=[
                pltpu.VMEM((V, L), logits.dtype),   # one-hot(labels), hoisted
                pltpu.VMEM((1, L), jnp.float32),    # A: sum logp
                pltpu.VMEM((1, L), jnp.float32),    # H: sum hit*logp
                pltpu.VMEM((1, L), jnp.float32),    # C: sum logp over no-hit rows
                pltpu.VMEM((1, L), jnp.float32),    # N: per-column hit counts
            ],
        ),
        compiler_params=pltpu.CompilerParams(
            dimension_semantics=("parallel", "arbitrary"),
            vmem_limit_bytes=int(vmem_limit),
        ),
    )(logits, labels3)

    numerators = numer_raw[:, 0, 0]                  # (B,)
    denominators = L + S - n + 1                     # sum(overlap.shape[-2:]) - n + 1
    return (numerators / denominators).mean()


def rouge_loss_ref(logits, labels, n=1):
    """Pure-JAX reference mirroring the PyTorch forward (sudoku == identity)."""
    B, S, V = logits.shape
    L = labels.shape[1]
    p = jax.nn.softmax(logits.astype(jnp.float32), axis=-1)               # (B, S, V)
    am = jnp.argmax(logits, axis=-1)                                      # (B, S)
    overlap = (labels[:, :, None] == am[:, None, :]).astype(jnp.float32)  # (B, L, S)
    row = overlap.sum(-1, keepdims=True)
    col = overlap.sum(-2, keepdims=True)
    overlap = jnp.where((row + col) == 0.0, 0.5, overlap)
    overlap = jnp.clip(overlap, 0.1, 1.0)
    b_idx = jnp.arange(B)[:, None, None]
    s_idx = jnp.arange(S)[None, None, :]
    probs = p[b_idx, s_idx, labels[:, :, None]]                           # (B, L, S)
    numer = -2.0 * (overlap * jnp.log(probs)).sum((-2, -1))               # (B,)
    denom = L + S - n + 1
    return (numer / denom).mean()


if __name__ == "__main__":
    key = jax.random.PRNGKey(0)
    k1, k2, k3, k4, k5, k6 = jax.random.split(key, 6)

    # Small shapes consistent with the module (vocab dim last, L <= max_length).
    B, S, V, L = 2, 8, 32, 8
    logits = jax.random.normal(k1, (B, S, V), dtype=jnp.float32)
    labels = jax.random.randint(k2, (B, L), 0, V, dtype=jnp.int32)
    loss = jax.block_until_ready(rouge_loss(logits, labels, n=1, reduction="mean"))
    ref = rouge_loss_ref(logits, labels, n=1)
    assert jnp.allclose(loss, ref, rtol=1e-4, atol=2e-4), (loss, ref)

    # Multi-tile S-accumulation path.
    B2, S2, V2, L2 = 2, 32, 64, 8
    logits2 = jax.random.normal(k3, (B2, S2, V2), dtype=jnp.float32)
    labels2 = jax.random.randint(k4, (B2, L2), 0, V2, dtype=jnp.int32)
    loss2 = jax.block_until_ready(
        rouge_loss(logits2, labels2, n=1, reduction="mean", s_tile=8))
    ref2 = rouge_loss_ref(logits2, labels2, n=1)
    assert jnp.allclose(loss2, ref2, rtol=1e-4, atol=2e-4), (loss2, ref2)

    # Padded-S path (S not a multiple of the tile -> in-kernel row masking).
    B3, S3, V3, L3 = 2, 20, 128, 8
    logits_p = jax.random.normal(k5, (B3, S3, V3), dtype=jnp.float32)
    labels_p = jax.random.randint(k6, (B3, L3), 0, V3, dtype=jnp.int32)
    loss3 = jax.block_until_ready(
        rouge_loss(logits_p, labels_p, n=1, reduction="mean", s_tile=8))
    ref3 = rouge_loss_ref(logits_p, labels_p, n=1)
    assert jnp.allclose(loss3, ref3, rtol=1e-4, atol=2e-4), (loss3, ref3)

    print("KERNEL_OK")
</pallas_src>

<mosaic_0001>
module attributes {stable_mosaic.version = 11 : i64} {
  func.func @_rouge_kernel(%arg0: i32, %arg1: i32, %arg2: memref<1x8x32xf32, #tpu.memory_space<vmem>>, %arg3: memref<1x1x8xi32, #tpu.memory_space<vmem>>, %arg4: memref<1x1x128xf32, #tpu.memory_space<vmem>>, %arg5: memref<32x8xf32, #tpu.memory_space<vmem>>, %arg6: memref<1x8xf32, #tpu.memory_space<vmem>>, %arg7: memref<1x8xf32, #tpu.memory_space<vmem>>, %arg8: memref<1x8xf32, #tpu.memory_space<vmem>>, %arg9: memref<1x8xf32, #tpu.memory_space<vmem>>) attributes {dimension_semantics = [#tpu.dimension_semantics<parallel>, #tpu.dimension_semantics<arbitrary>], iteration_bounds = array<i64: 2, 1>, scalar_prefetch = 0 : i64, scratch_operands = 5 : i64, tpu.core_type = #tpu.core_type<tc>, window_params = [{transform_indices = @transform_0, window_bounds = array<i64: 1, 8, 32>}, {transform_indices = @transform_1, window_bounds = array<i64: 1, 1, 8>}, {transform_indices = @transform_2, window_bounds = array<i64: 1, 1, 128>}]} {
    %c0 = arith.constant 0 : index
    %c0_0 = arith.constant 0 : index
    %c0_1 = arith.constant 0 : index
    %0 = vector.load %arg2[%c0, %c0_0, %c0_1] : memref<1x8x32xf32, #tpu.memory_space<vmem>>, vector<1x8x32xf32>
    %1 = vector.shape_cast %0 : vector<1x8x32xf32> to vector<8x32xf32>
    %c0_2 = arith.constant 0 : index
    %c0_3 = arith.constant 0 : index
    %c0_4 = arith.constant 0 : index
    %2 = vector.load %arg3[%c0_2, %c0_3, %c0_4] : memref<1x1x8xi32, #tpu.memory_space<vmem>>, vector<1x1x8xi32>
    %3 = vector.shape_cast %2 : vector<1x1x8xi32> to vector<1x8xi32>
    %c0_i32 = arith.constant 0 : i32
    %4 = arith.cmpi eq, %arg1, %c0_i32 : i32
    %5 = arith.extui %4 : i1 to i32
    %c0_i32_5 = arith.constant 0 : i32
    %6 = arith.cmpi ne, %5, %c0_i32_5 : i32
    scf.if %6 {
      %61 = tpu.iota {dimensions = array<i32: 0>} : vector<32x8xi32>
      %62 = vector.broadcast %3 : vector<1x8xi32> to vector<32x8xi32>
      %63 = arith.cmpi eq, %61, %62 : vector<32x8xi32>
      %64 = arith.extui %63 : vector<32x8xi1> to vector<32x8xi32>
      %65 = arith.sitofp %64 : vector<32x8xi32> to vector<32x8xf32>
      %c0_36 = arith.constant 0 : index
      %c0_37 = arith.constant 0 : index
      %66 = vector.load %arg5[%c0_36, %c0_37] : memref<32x8xf32, #tpu.memory_space<vmem>>, vector<32x8xf32>
      tpu.vector_store %arg5[%c0_36, %c0_37], %65 {strides = array<i32>} : memref<32x8xf32, #tpu.memory_space<vmem>>, vector<32x8xf32>,
      %cst_38 = arith.constant 0.000000e+00 : f32
      %67 = vector.broadcast %cst_38 : f32 to vector<1x8xf32>
      %c0_39 = arith.constant 0 : index
      %c0_40 = arith.constant 0 : index
      %68 = vector.load %arg6[%c0_39, %c0_40] : memref<1x8xf32, #tpu.memory_space<vmem>>, vector<1x8xf32>
      tpu.vector_store %arg6[%c0_39, %c0_40], %67 {strides = array<i32>} : memref<1x8xf32, #tpu.memory_space<vmem>>, vector<1x8xf32>,
      %cst_41 = arith.constant 0.000000e+00 : f32
      %69 = vector.broadcast %cst_41 : f32 to vector<1x8xf32>
      %c0_42 = arith.constant 0 : index
      %c0_43 = arith.constant 0 : index
      %70 = vector.load %arg7[%c0_42, %c0_43] : memref<1x8xf32, #tpu.memory_space<vmem>>, vector<1x8xf32>
      tpu.vector_store %arg7[%c0_42, %c0_43], %69 {strides = array<i32>} : memref<1x8xf32, #tpu.memory_space<vmem>>, vector<1x8xf32>,
      %cst_44 = arith.constant 0.000000e+00 : f32
      %71 = vector.broadcast %cst_44 : f32 to vector<1x8xf32>
      %c0_45 = arith.constant 0 : index
      %c0_46 = arith.constant 0 : index
      %72 = vector.load %arg8[%c0_45, %c0_46] : memref<1x8xf32, #tpu.memory_space<vmem>>, vector<1x8xf32>
      tpu.vector_store %arg8[%c0_45, %c0_46], %71 {strides = array<i32>} : memref<1x8xf32, #tpu.memory_space<vmem>>, vector<1x8xf32>,
      %cst_47 = arith.constant 0.000000e+00 : f32
      %73 = vector.broadcast %cst_47 : f32 to vector<1x8xf32>
      %c0_48 = arith.constant 0 : index
      %c0_49 = arith.constant 0 : index
      %74 = vector.load %arg9[%c0_48, %c0_49] : memref<1x8xf32, #tpu.memory_space<vmem>>, vector<1x8xf32>
      tpu.vector_store %arg9[%c0_48, %c0_49], %73 {strides = array<i32>} : memref<1x8xf32, #tpu.memory_space<vmem>>, vector<1x8xf32>,
    } else {
    }
    %cst = arith.constant dense<0xFF800000> : vector<8xf32>
    %7 = vector.multi_reduction <maximumf>, %1, %cst [1] : vector<8x32xf32> to vector<8xf32>
    %8 = vector.shape_cast %7 : vector<8xf32> to vector<8x1xf32>
    %9 = vector.broadcast %8 : vector<8x1xf32> to vector<8x32xf32>
    %10 = arith.subf %1, %9 : vector<8x32xf32>
    %11 = math.exp %10 : vector<8x32xf32>
    %cst_6 = arith.constant dense<0.000000e+00> : vector<8xf32>
    %12 = vector.multi_reduction <add>, %11, %cst_6 [1] : vector<8x32xf32> to vector<8xf32>
    %13 = vector.shape_cast %12 : vector<8xf32> to vector<8x1xf32>
    %14 = math.log %13 : vector<8x1xf32>
    %15 = arith.addf %8, %14 : vector<8x1xf32>
    %c0_7 = arith.constant 0 : index
    %c0_8 = arith.constant 0 : index
    %16 = vector.load %arg5[%c0_7, %c0_8] : memref<32x8xf32, #tpu.memory_space<vmem>>, vector<32x8xf32>
    %cst_9 = arith.constant dense<0.000000e+00> : vector<8x8xf32>
    %17 = tpu.matmul %1, %16, %cst_9 {dimension_numbers = #tpu.dot_dimension_numbers<[1], [0], [0], [1], [0, 0, 1, 1], [], []>} : vector<8x32xf32>, vector<32x8xf32>, vector<8x8xf32> -> vector<8x8xf32>
    %18 = vector.broadcast %15 : vector<8x1xf32> to vector<8x8xf32>
    %19 = arith.subf %17, %18 : vector<8x8xf32>
    %20 = vector.broadcast %8 : vector<8x1xf32> to vector<8x32xf32>
    %21 = arith.cmpf oeq, %1, %20 : vector<8x32xf32>
    %22 = arith.extui %21 : vector<8x32xi1> to vector<8x32xi32>
    %23 = arith.sitofp %22 : vector<8x32xi32> to vector<8x32xf32>
    %cst_10 = arith.constant dense<0.000000e+00> : vector<8x8xf32>
    %24 = tpu.matmul %23, %16, %cst_10 {dimension_numbers = #tpu.dot_dimension_numbers<[1], [0], [0], [1], [0, 0, 1, 1], [], []>} : vector<8x32xf32>, vector<32x8xf32>, vector<8x8xf32> -> vector<8x8xf32>
    %cst_11 = arith.constant 5.000000e-01 : f32
    %25 = vector.broadcast %cst_11 : f32 to vector<8x8xf32>
    %26 = arith.cmpf ogt, %24, %25 : vector<8x8xf32>
    %27 = arith.extui %26 : vector<8x8xi1> to vector<8x8xi32>
    %28 = arith.sitofp %27 : vector<8x8xi32> to vector<8x8xf32>
    %cst_12 = arith.constant dense<0.000000e+00> : vector<8xf32>
    %29 = vector.multi_reduction <add>, %28, %cst_12 [1] : vector<8x8xf32> to vector<8xf32>
    %30 = vector.shape_cast %29 : vector<8xf32> to vector<8x1xf32>
    %cst_13 = arith.constant 0.000000e+00 : f32
    %31 = vector.broadcast %cst_13 : f32 to vector<8x1xf32>
    %32 = arith.cmpf oeq, %30, %31 : vector<8x1xf32>
    %33 = arith.extui %32 : vector<8x1xi1> to vector<8x1xi32>
    %34 = arith.sitofp %33 : vector<8x1xi32> to vector<8x1xf32>
    %c0_14 = arith.constant 0 : index
    %c0_15 = arith.constant 0 : index
    %35 = vector.load %arg6[%c0_14, %c0_15] : memref<1x8xf32, #tpu.memory_space<vmem>>, vector<1x8xf32>
    %cst_16 = arith.constant dense<0.000000e+00> : vector<8xf32>
    %36 = vector.multi_reduction <add>, %19, %cst_16 [0] : vector<8x8xf32> to vector<8xf32>
    %37 = vector.shape_cast %36 : vector<8xf32> to vector<1x8xf32>
    %38 = arith.addf %35, %37 : vector<1x8xf32>
    %c0_17 = arith.constant 0 : index
    %c0_18 = arith.constant 0 : index
    %39 = vector.load %arg6[%c0_17, %c0_18] : memref<1x8xf32, #tpu.memory_space<vmem>>, vector<1x8xf32>
    tpu.vector_store %arg6[%c0_17, %c0_18], %38 {strides = array<i32>} : memref<1x8xf32, #tpu.memory_space<vmem>>, vector<1x8xf32>,
    %c0_19 = arith.constant 0 : index
    %c0_20 = arith.constant 0 : index
    %40 = vector.load %arg7[%c0_19, %c0_20] : memref<1x8xf32, #tpu.memory_space<vmem>>, vector<1x8xf32>
    %41 = arith.mulf %28, %19 : vector<8x8xf32>
    %cst_21 = arith.constant dense<0.000000e+00> : vector<8xf32>
    %42 = vector.multi_reduction <add>, %41, %cst_21 [0] : vector<8x8xf32> to vector<8xf32>
    %43 = vector.shape_cast %42 : vector<8xf32> to vector<1x8xf32>
    %44 = arith.addf %40, %43 : vector<1x8xf32>
    %c0_22 = arith.constant 0 : index
    %c0_23 = arith.constant 0 : index
    %45 = vector.load %arg7[%c0_22, %c0_23] : memref<1x8xf32, #tpu.memory_space<vmem>>, vector<1x8xf32>
    tpu.vector_store %arg7[%c0_22, %c0_23], %44 {strides = array<i32>} : memref<1x8xf32, #tpu.memory_space<vmem>>, vector<1x8xf32>,
    %c0_24 = arith.constant 0 : index
    %c0_25 = arith.constant 0 : index
    %46 = vector.load %arg8[%c0_24, %c0_25] : memref<1x8xf32, #tpu.memory_space<vmem>>, vector<1x8xf32>
    %47 = vector.broadcast %34 : vector<8x1xf32> to vector<8x8xf32>
    %48 = arith.mulf %47, %19 : vector<8x8xf32>
    %cst_26 = arith.constant dense<0.000000e+00> : vector<8xf32>
    %49 = vector.multi_reduction <add>, %48, %cst_26 [0] : vector<8x8xf32> to vector<8xf32>
    %50 = vector.shape_cast %49 : vector<8xf32> to vector<1x8xf32>
    %51 = arith.addf %46, %50 : vector<1x8xf32>
    %c0_27 = arith.constant 0 : index
    %c0_28 = arith.constant 0 : index
    %52 = vector.load %arg8[%c0_27, %c0_28] : memref<1x8xf32, #tpu.memory_space<vmem>>, vector<1x8xf32>
    tpu.vector_store %arg8[%c0_27, %c0_28], %51 {strides = array<i32>} : memref<1x8xf32, #tpu.memory_space<vmem>>, vector<1x8xf32>,
    %c0_29 = arith.constant 0 : index
    %c0_30 = arith.constant 0 : index
    %53 = vector.load %arg9[%c0_29, %c0_30] : memref<1x8xf32, #tpu.memory_space<vmem>>, vector<1x8xf32>
    %cst_31 = arith.constant dense<0.000000e+00> : vector<8xf32>
    %54 = vector.multi_reduction <add>, %28, %cst_31 [0] : vector<8x8xf32> to vector<8xf32>
    %55 = vector.shape_cast %54 : vector<8xf32> to vector<1x8xf32>
    %56 = arith.addf %53, %55 : vector<1x8xf32>
    %c0_32 = arith.constant 0 : index
    %c0_33 = arith.constant 0 : index
    %57 = vector.load %arg9[%c0_32, %c0_33] : memref<1x8xf32, #tpu.memory_space<vmem>>, vector<1x8xf32>
    tpu.vector_store %arg9[%c0_32, %c0_33], %56 {strides = array<i32>} : memref<1x8xf32, #tpu.memory_space<vmem>>, vector<1x8xf32>,
    %c0_i32_34 = arith.constant 0 : i32
    %58 = arith.cmpi eq, %arg1, %c0_i32_34 : i32
    %59 = arith.extui %58 : i1 to i32
    %c0_i32_35 = arith.constant 0 : i32
    %60 = arith.cmpi ne, %59, %c0_i32_35 : i32
    scf.if %60 {
      %c0_36 = arith.constant 0 : index
      %c0_37 = arith.constant 0 : index
      %61 = vector.load %arg9[%c0_36, %c0_37] : memref<1x8xf32, #tpu.memory_space<vmem>>, vector<1x8xf32>
      %cst_38 = arith.constant 0.000000e+00 : f32
      %62 = vector.broadcast %cst_38 : f32 to vector<1x8xf32>
      %63 = arith.cmpf oeq, %61, %62 : vector<1x8xf32>
      %64 = arith.extui %63 : vector<1x8xi1> to vector<1x8xi32>
      %65 = arith.sitofp %64 : vector<1x8xi32> to vector<1x8xf32>
      %c0_39 = arith.constant 0 : index
      %c0_40 = arith.constant 0 : index
      %66 = vector.load %arg6[%c0_39, %c0_40] : memref<1x8xf32, #tpu.memory_space<vmem>>, vector<1x8xf32>
      %67 = vector.shape_cast %66 : vector<1x8xf32> to vector<1x1x8xf32>
      %cst_41 = arith.constant dense<0.000000e+00> : vector<1xf32>
      %68 = vector.multi_reduction <add>, %67, %cst_41 [1, 2] : vector<1x1x8xf32> to vector<1xf32>
      %69 = vector.shape_cast %68 : vector<1xf32> to vector<1x1x1xf32>
      %70 = vector.extract %69[0, 0, 0] : f32 from vector<1x1x1xf32>
      %cst_42 = arith.constant 1.000000e-01 : f32
      %71 = arith.mulf %cst_42, %70 : f32
      %c0_43 = arith.constant 0 : index
      %c0_44 = arith.constant 0 : index
      %72 = vector.load %arg7[%c0_43, %c0_44] : memref<1x8xf32, #tpu.memory_space<vmem>>, vector<1x8xf32>
      %73 = vector.shape_cast %72 : vector<1x8xf32> to vector<1x1x8xf32>
      %cst_45 = arith.constant dense<0.000000e+00> : vector<1xf32>
      %74 = vector.multi_reduction <add>, %73, %cst_45 [1, 2] : vector<1x1x8xf32> to vector<1xf32>
      %75 = vector.shape_cast %74 : vector<1xf32> to vector<1x1x1xf32>
      %76 = vector.extract %75[0, 0, 0] : f32 from vector<1x1x1xf32>
      %cst_46 = arith.constant 0.899999976 : f32
      %77 = arith.mulf %cst_46, %76 : f32
      %78 = arith.addf %71, %77 : f32
      %c0_47 = arith.constant 0 : index
      %c0_48 = arith.constant 0 : index
      %79 = vector.load %arg8[%c0_47, %c0_48] : memref<1x8xf32, #tpu.memory_space<vmem>>, vector<1x8xf32>
      %80 = arith.mulf %65, %79 : vector<1x8xf32>
      %81 = vector.shape_cast %80 : vector<1x8xf32> to vector<1x1x8xf32>
      %cst_49 = arith.constant dense<0.000000e+00> : vector<1xf32>
      %82 = vector.multi_reduction <add>, %81, %cst_49 [1, 2] : vector<1x1x8xf32> to vector<1xf32>
      %83 = vector.shape_cast %82 : vector<1xf32> to vector<1x1x1xf32>
      %84 = vector.extract %83[0, 0, 0] : f32 from vector<1x1x1xf32>
      %cst_50 = arith.constant 4.000000e-01 : f32
      %85 = arith.mulf %cst_50, %84 : f32
      %86 = arith.addf %78, %85 : f32
      %cst_51 = arith.constant -2.000000e+00 : f32
      %87 = arith.mulf %cst_51, %86 : f32
      %88 = vector.broadcast %87 : f32 to vector<1x1x128xf32>
      %c0_52 = arith.constant 0 : index
      %c0_53 = arith.constant 0 : index
      %c0_54 = arith.constant 0 : index
      %89 = vector.load %arg4[%c0_52, %c0_53, %c0_54] : memref<1x1x128xf32, #tpu.memory_space<vmem>>, vector<1x1x128xf32>
      tpu.vector_store %arg4[%c0_52, %c0_53, %c0_54], %88 {strides = array<i32>} : memref<1x1x128xf32, #tpu.memory_space<vmem>>, vector<1x1x128xf32>,
    } else {
    }
    return
  }
  func.func @transform_0(%arg0: i32, %arg1: i32) -> (i32, i32, i32) {
    %c0_i32 = arith.constant 0 : i32
    %c0_i32_0 = arith.constant 0 : i32
    return %arg0, %arg1, %c0_i32 : i32, i32, i32
  }
  func.func @transform_1(%arg0: i32, %arg1: i32) -> (i32, i32, i32) {
    %c0_i32 = arith.constant 0 : i32
    %c0_i32_0 = arith.constant 0 : i32
    %c0_i32_1 = arith.constant 0 : i32
    return %arg0, %c0_i32, %c0_i32_0 : i32, i32, i32
  }
  func.func @transform_2(%arg0: i32, %arg1: i32) -> (i32, i32, i32) {
    %c0_i32 = arith.constant 0 : i32
    %c0_i32_0 = arith.constant 0 : i32
    %c0_i32_1 = arith.constant 0 : i32
    return %arg0, %c0_i32, %c0_i32_0 : i32, i32, i32
  }
}

</mosaic_0001>

<bundles_post_ra>
// kernel: rouge_loss.1
= control target key start
LH: loop header
LB: loop body
LE: loop exit
PB: predicated region body
PF: predicated region fallthrough
CT: control target
= control target key end

     0   :  { %7 = vsyncpa [#allocation8], 0  ;;  %s853_s0 = inlined_call_operand.hbm [shape: f32[2,8,32], index: 0, kind: input, shape index: {}]   ;;  %s854_s1 = inlined_call_operand.hbm [shape: s32[2,1,8], index: 1, kind: input, shape index: {}]   ;;  %s855_s2 = inlined_call_operand.vmem [shape: f32[2,1,128], index: 2, kind: output, shape index: {}]  }
   0x1   :  { %9 = vsyncpa [#allocation8 + $0x1], 0 }
   0x2   :  { %10 = vsyncpa [#allocation10], 0 }
   0x3   :  { %12 = vsyncpa [#allocation10 + $0x1], 0  ;;  %s722_s9 = smov 0   ;;  %s724_s10 = smov 0  }
   0x4   :  { %s726_s11 = smov 0   ;;  %s728_s12 = smov 0  }
   0x5   :  { %s730_s13 = smov 0   ;;  %s732_s14 = smov 0  }
   0x6 LB: > { %s498_s15 = sadd.s32 4294967295, %s704_s14   ;;  %s30_s16 = sadd.s32 1, %s700_s13  ;;  %s704_s14 = sphi %s732_s14, %s18_s14   ;;  %s700_s13 = sphi %s730_s13, %s862_s13   ;;  %s696_s12 = sphi %s728_s12, %s861_s12   ;;  %s692_s11 = sphi %s726_s11, %s860_s11   ;;  %s688_s10 = sphi %s724_s10, %s859_s10   ;;  %s684_s9 = sphi %s722_s9, %s858_s9  }
   0x7   : > { %p32_p0 = scmp.ge.s32.totalorder %s30_s16, 2  ;;  %s39_s17 = sadd.s32 1, %s692_s11 }
   0x8   : > { %p46_p1 = scmp.ne.s32.totalorder %s692_s11, %s688_s10  ;;  %p47_p2 = scmp.eq.s32.totalorder %s704_s14, 0 }
   0x9   : > { %s864_s16 = smov (%p32_p0, %s30_s16), 0  ;;  %p52_p4 = scmp.ne.s32.totalorder %s688_s10, %s684_s9 }
   0xa   : > { %p758_p3 = por %p47_p2, %p46_p1  ;;  %s34_s19 = ssub.s32 %s700_s13, %s864_s16 }
   0xb   : > { %p53_p5 = scmp.eq.s32.totalorder %s498_s15, 0  ;;  %p37_p6 = scmp.eq.s32.totalorder %s34_s19, 0 }
   0xc   : > { %p535_p8 = scmp.lt.s32.totalorder %s704_s14, 2  ;;  %s128_s22 = sand.u32 1, %s692_s11  }
   0xd   : > { %p765_p7 = por %p53_p5, %p52_p4  ;;  %s503_s23 = sshll.u32 %s700_s13, 3 }
   0xe   : > { %s771_s21 = scalar_select %p37_p6, %s692_s11, %s39_s17  }
   0xf   : > { %s502_s24 = sshll.u32 %s128_s22, 3  ;;  %s137_s27 = scalar_lea.hbm %s853_s0, %s503_s23 }
  0x10   : > { %s139_s28 = sshll.u32 %s137_s27, 4  ;;  %s132_s29 = scalar_lea.vmem [#allocation7], %s502_s24  ;;  %s140_s28 = int_to_ptr.hbm [resolvable:$true] %s139_s28 }
  0x11   : > { %s141_s30 = sshll.u32 %s132_s29, 4  ;;  %p529_p9 = pnand %p535_p8, %p758_p3  ;;  %s142_s30 = int_to_ptr.vmem [resolvable:$true] %s141_s30 }
  0x12   : > { %p504_p10 = scmp.ge.s32.totalorder %s704_s14, 1  ;;  %p163_p11 = scmp.lt.s32.totalorder %s704_s14, 3 }
  0x13   : > { %s129_s3 = scalar_lea.sflag [#allocation8], %s128_s22  ;;  %s154_s6 = scalar_lea.hbm %s854_s1, %s700_s13 }
  0x14   : > { %531 = dma.hbm_to_vmem [thread:$0]  (!%p529_p9), %s140_s28, 128, %s142_s30, %s129_s3  }
  0x15   : > { %p164_p12 = pnand %p504_p10, %p163_p11  ;;  %s156_s7 = sshll.u32 %s154_s6, 4  ;;  %s157_s7 = int_to_ptr.hbm [resolvable:$true] %s156_s7 }
  0x16   : > { %s151_s8 = scalar_lea.vmem [#allocation9], %s128_s22  ;;  %s149_s15 = scalar_lea.sflag [#allocation10], %s128_s22 }
  0x17   : > { %s158_s9 = sshll.u32 %s151_s8, 4  ;;  %167 = sbr.rel (%p164_p12) target bundleno = 612 (0x264), region = 28  ;;  %s159_s9 = int_to_ptr.vmem [resolvable:$true] %s158_s9 }
  0x18   : > { %534 = dma.hbm_to_vmem [thread:$0]  (!%p529_p9), %s157_s7, 16, %s159_s9, %s149_s15  }
  0x19   : > { %s169_s17 = sand.u32 (!%p164_p12), 1, %s688_s10  }
  0x1a   : > { %s505_s18 = sshll.u32 (!%p164_p12), %s169_s17, 3  ;;  %s170_s19 = scalar_lea.sflag (!%p164_p12), [#allocation8], %s169_s17 }
  0x1b   : > { %s173_s23 = scalar_lea.vmem (!%p164_p12), [#allocation7], %s505_s18 }
  0x1c   : > { %675 = dma.done.wait (%p765_p7), %s170_s19, 128  }
  0x1d   : > { %677 = vsyncadd (%p765_p7), %s170_s19, 4294967168  ;;  %s180_s24 = scalar_lea.sflag [#allocation10], %s169_s17  ;;  %s182_s25 = scalar_lea.vmem [#allocation9], %s169_s17 }
  0x1e   : > { %679 = dma.done.wait (%p765_p7), %s180_s24, 16  }
  0x1f   : > { %681 = vsyncadd (%p765_p7), %s180_s24, 4294967280  ;;  %v215_v0 = vlaneseq  ;;  %vm243_vm0 = vcmask 261120   ;;  %v209_v5 = vld [vmem:[%s173_s23] sm:$0xff]  ;;  %v585_v6 = vld [vmem:[%s182_s25] ss:$0 sm:$0xff]  ;;  %vm233_vm1 = vcmask 64512  }
  0x20   : > { %v244_v7 = vsel %vm243_vm0, %v209_v5, -inf  ;;  %v706_v8 = vmov 0.0   ;;  %vm238_vm7 = vcmask 57344   ;;  %p206_p13 = scmp.lt.s32.totalorder %s696_s12, 1 }
  0x21   : > { %v216_v1 = vshrl.u32 %v215_v0, 7  ;;  %245 = vmax.xlane.f32.xlu0 %v244_v7  ;;  %242 = vst.msk [vmem:[#allocation6] sm:$0x1] %vm238_vm7, %v706_v8 }
  0x22   : > { %239 = vst.msk [vmem:[#allocation3] sm:$0x1] %vm238_vm7, %v706_v8  ;;  %s866_s12 = smov (!%p206_p13, %s696_s12), 1 }
  0x23   : > { %v219_v2 = vadd.s32 24, %v216_v1  ;;  %v218_v3 = vadd.s32 16, %v216_v1  ;;  %v217_v4 = vadd.s32 8, %v216_v1  ;;  %vm221_vm5 = vcmp.eq.s32.totalorder %v216_v1, %v585_v6  ;;  %240 = vst.msk [vmem:[#allocation4] sm:$0x1] %vm238_vm7, %v706_v8  ;;  %s208_s6 = scalar_lea.vmem %s855_s2, %s866_s12 }
  0x24   : > { %v506_v15 = vsel %vm221_vm5, 1.0, %v706_v8  ;;  %241 = vst.msk [vmem:[#allocation5] sm:$0x1] %vm238_vm7, %v706_v8 }
  0x25   : > { %vm224_vm2 = vcmp.eq.s32.totalorder %v219_v2, %v585_v6  ;;  %vm223_vm3 = vcmp.eq.s32.totalorder %v218_v3, %v585_v6  ;;  %vm222_vm4 = vcmp.eq.s32.totalorder %v217_v4, %v585_v6  ;;  %234 = vst.msk [vmem:[#allocation2] sm:$0xff] %vm233_vm1, %v506_v15 }
  0x26   : > { %v509_v9 = vsel %vm224_vm2, 1.0, %v706_v8  ;;  %v508_v10 = vsel %vm223_vm3, 1.0, %v706_v8  ;;  %v507_v11 = vsel %vm222_vm4, 1.0, %v706_v8 }
  0x27   : > { %237 = vst.msk [vmem:[#allocation2 + $0x18] sm:$0xff] %vm233_vm1, %v509_v9 }
  0x28   : > { %236 = vst.msk [vmem:[#allocation2 + $0x10] sm:$0xff] %vm233_vm1, %v508_v10  ;;  %v353_v37 = vld [vmem:[#allocation6] sm:$0x1] }
  0x29   : > { %235 = vst.msk [vmem:[#allocation2 + $0x8] sm:$0xff] %vm233_vm1, %v507_v11  ;;  %v320_v52 = vld [vmem:[#allocation3] sm:$0x1] }
  0x2a   : > { %v331_v55 = vld [vmem:[#allocation4] sm:$0x1] }
  0x2b   : > { %v342_v9 = vld [vmem:[#allocation5] sm:$0x1] }
  0x2c   : > { %v256_v16 = vld [vmem:[#allocation2] sm:$0xff] }
  0x2e   : > { %v259_v12 = vld [vmem:[#allocation2 + $0x18] sm:$0xff] }
  0x2f   : > { %302 = vmatpush.msra.mxu1 %v259_v12  ;;  %v258_v13 = vld [vmem:[#allocation2 + $0x10] sm:$0xff]  ;;  %275 = vmatpush.msra.mxu0 %v259_v12 }
  0x30   : > { %v257_v14 = vld [vmem:[#allocation2 + $0x8] sm:$0xff] }
  0x31   : > { %303 = vmatpush.msra.mxu1 %v258_v13  ;;  %276 = vmatpush.msra.mxu0 %v258_v13 }
  0x33   : > { %304 = vmatpush.msra.mxu1 %v257_v14  ;;  %277 = vmatpush.msra.mxu0 %v257_v14 }
  0x35   : > { %305 = vmatpush.msra.mxu1 %v256_v16  ;;  %278 = vmatpush.msra.mxu0 %v256_v16 }
  0x36   : > { %510 = vmatmul.msk.f32.vlgmr.msra.gmra.mxu0 %vm243_vm0, %v209_v5 }
  0x94   : > { %v246_v17 = vpop.xlane.xlu0 %245 }
  0x95   : > { %v247_v18 = vsub.f32 %v209_v5, %v246_v17  ;;  %vm284_vm6 = vcmp.eq.f32.partialorder %v209_v5, %v246_v17 }
  0x96   : > { %v511_v19 = vsel %vm284_vm6, 1.0, %v706_v8 }
  0x97   : > { %v248_v20 = vmul.f32 1.442695, %v247_v18  ;;  %512 = vmatmul.msk.f32.vlgmr.msra.gmra.mxu1 %vm243_vm0, %v511_v19 }
  0x99   : > { %586 = vpow2.f32 %v248_v20 }
  0x9f   : > { %v587_v21 = vpop.eup %586 }
  0xa0   : > { %v250_v22 = vsel %vm243_vm0, %v587_v21, 0.0 }
  0xa1   : > { %251 = vadd.xlane.f32.xlu0 %v250_v22 }
  0xb3   : > { %v280_v32 = vpop.f32.mrf.mxu0 }
 0x114   : > { %v307_v23 = vpop.f32.mrf.mxu1  ;;  %v252_v24 = vpop.xlane.xlu0 %251 }
 0x115   : > { %vm310_vm8 = vcmp.gt.f32.partialorder %v307_v23, 0.5  ;;  %588 = vlog2.f32 %v252_v24 }
 0x116   : > { %v513_v25 = vsel %vm310_vm8, 1.0, %v706_v8 }
 0x117   : > { %v314_v26 = vsel %vm233_vm1, %v513_v25, 0.0 }
 0x118   : > { %315 = vadd.xlane.f32.xlu1 %v314_v26  ;;  %v354_v27 = vrot.slane %v314_v26, 4 }
 0x11a   : > { %v355_v28 = vadd.f32 %v354_v27, %v314_v26 }
 0x11b   : > { %v589_v29 = vpop.eup %588 }
 0x11c   : > { %v254_v30 = vmul.f32 0.6931472, %v589_v29  ;;  %v356_v31 = vrot.slane %v355_v28, 2 }
 0x11e   : > { %v357_v33 = vadd.f32 %v356_v31, %v355_v28  ;;  %v255_v34 = vadd.f32 %v254_v30, %v246_v17 }
 0x120   : > { %v358_v35 = vrot.slane %v357_v33, 1  ;;  %v283_v36 = vsub.f32 %v280_v32, %v255_v34 }
 0x122   : > { %v359_v38 = vadd.f32 %v358_v35, %v357_v33  ;;  %v321_v39 = vsel %vm233_vm1, %v283_v36, 0.0  ;;  %v332_v40 = vmul.f32 %v513_v25, %v283_v36 }
 0x123   : > { %v322_v41 = vrot.slane %v321_v39, 4 }
 0x124   : > { %v360_v42 = vadd.f32 %v359_v38, %v353_v37  ;;  %v333_v43 = vsel %vm233_vm1, %v332_v40, 0.0 }
 0x125   : > { %v323_v44 = vadd.f32 %v322_v41, %v321_v39  ;;  %v334_v45 = vrot.slane %v333_v43, 4 }
 0x126   : > { %361 = vst.msk [vmem:[#allocation6] sm:$0x1] %vm238_vm7, %v360_v42 }
 0x127   : > { %v324_v46 = vrot.slane %v323_v44, 2  ;;  %v335_v47 = vadd.f32 %v334_v45, %v333_v43 }
 0x129   : > { %v325_v48 = vadd.f32 %v324_v46, %v323_v44  ;;  %v336_v49 = vrot.slane %v335_v47, 2 }
 0x12b   : > { %v326_v50 = vrot.slane %v325_v48, 1  ;;  %v337_v51 = vadd.f32 %v336_v49, %v335_v47 }
 0x12d   : > { %v327_v53 = vadd.f32 %v326_v50, %v325_v48  ;;  %v338_v54 = vrot.slane %v337_v51, 1  ;;  %v365_v12 = vld [vmem:[#allocation6] sm:$0x1] }
 0x12e   : > { %vm366_vm10 = vcmp.eq.f32.partialorder %v365_v12, 0.0 }
 0x12f   : > { %v328_v56 = vadd.f32 %v327_v53, %v320_v52  ;;  %v339_v57 = vadd.f32 %v338_v54, %v337_v51  ;;  %v515_v13 = vsel %vm366_vm10, 1.0, %v706_v8 }
 0x131   : > { %330 = vst.msk [vmem:[#allocation3] sm:$0x1] %vm238_vm7, %v328_v56  ;;  %v340_v58 = vadd.f32 %v339_v57, %v331_v55 }
 0x133   : > { %341 = vst.msk [vmem:[#allocation4] sm:$0x1] %vm238_vm7, %v340_v58 }
 0x138   : > { %v369_v59 = vld [vmem:[#allocation3] sm:$0x1] }
 0x139   : > { %v370_v60 = vsel %vm238_vm7, %v369_v59, 0.0 }
 0x13a   : > { %371 = vadd.xlane.f32.xlu1 %v370_v60  ;;  %v381_v61 = vld [vmem:[#allocation4] sm:$0x1] }
 0x13b   : > { %v382_v62 = vsel %vm238_vm7, %v381_v61, 0.0 }
 0x13c   : > { %383 = vadd.xlane.f32.xlu2 %v382_v62 }
 0x18b   : > { %v316_v63 = vpop.xlane.xlu1 %315 }
 0x18c   : > { %vm317_vm9 = vcmp.eq.f32.partialorder %v316_v63, 0.0 }
 0x18d   : > { %v514_v0 = vsel %vm317_vm9, 1.0, %v706_v8 }
 0x18e   : > { %v343_v1 = vmul.f32 %v514_v0, %v283_v36 }
 0x190   : > { %v344_v2 = vsel %vm233_vm1, %v343_v1, 0.0 }
 0x191   : > { %v345_v3 = vrot.slane %v344_v2, 4 }
 0x193   : > { %v346_v4 = vadd.f32 %v345_v3, %v344_v2 }
 0x195   : > { %v347_v5 = vrot.slane %v346_v4, 2 }
 0x197   : > { %v348_v6 = vadd.f32 %v347_v5, %v346_v4 }
 0x199   : > { %v349_v7 = vrot.slane %v348_v6, 1 }
 0x19b   : > { %v350_v10 = vadd.f32 %v349_v7, %v348_v6 }
 0x19d   : > { %v351_v11 = vadd.f32 %v350_v10, %v342_v9 }
 0x19f   : > { %352 = vst.msk [vmem:[#allocation5] sm:$0x1] %vm238_vm7, %v351_v11 }
 0x1a6   : > { %v394_v14 = vld [vmem:[#allocation5] sm:$0x1] }
 0x1a7   : > { %v395_v15 = vmul.f32 %v515_v13, %v394_v14 }
 0x1a9   : > { %v396_v16 = vsel %vm238_vm7, %v395_v15, 0.0 }
 0x1aa   : > { %397 = vadd.xlane.f32.xlu2 %v396_v16 }
 0x1ad   : > { %v372_v17 = vpop.xlane.xlu1 %371 }
 0x1ae   : > { %v373_v18 = vrot.slane %v372_v17, 4 }
 0x1af   : > { %v384_v19 = vpop.xlane.xlu2 %383 }
 0x1b0   : > { %v374_v20 = vadd.f32 %v373_v18, %v372_v17  ;;  %v385_v21 = vrot.slane %v384_v19, 4 }
 0x1b2   : > { %v375_v22 = vrot.slane %v374_v20, 2  ;;  %v386_v23 = vadd.f32 %v385_v21, %v384_v19 }
 0x1b4   : > { %v387_v24 = vrot.slane %v386_v23, 2  ;;  %v376_v25 = vadd.f32 %v375_v22, %v374_v20 }
 0x1b6   : > { %v377_v26 = vrot.slane %v376_v25, 1  ;;  %v388_v27 = vadd.f32 %v387_v24, %v386_v23 }
 0x1b8   : > { %v378_v28 = vadd.f32 %v377_v26, %v376_v25  ;;  %v389_v29 = vrot.slane %v388_v27, 1 }
 0x1ba   : > { %518 = vpush %v378_v28  ;;  %v390_v8 = vadd.f32 %v389_v29, %v388_v27 }
 0x1bc   : > { %520 = vpush %v390_v8 }
 0x1eb   : > { %s519_s20 = spop %518 }
 0x1ec   : > { %s380_s27 = smul.f32 0.1, %s519_s20 }
 0x1ed   : > { %s521_s22 = spop %520 }
 0x1ee   : > { %s392_s26 = smul.f32 0.9, %s521_s22 }
 0x1f0   : > { %s393_s29 = sadd.f32 %s392_s26, %s380_s27 }
 0x21d   : > { %v398_v30 = vpop.xlane.xlu2 %397 }
 0x21e   : > { %v399_v31 = vrot.slane %v398_v30, 4 }
 0x220   : > { %v400_v32 = vadd.f32 %v399_v31, %v398_v30 }
 0x222   : > { %v401_v33 = vrot.slane %v400_v32, 2 }
 0x224   : > { %v402_v34 = vadd.f32 %v401_v33, %v400_v32 }
 0x226   : > { %v403_v35 = vrot.slane %v402_v34, 1 }
 0x228   : > { %v404_v36 = vadd.f32 %v403_v35, %v402_v34 }
 0x22a   : > { %522 = vpush %v404_v36 }
 0x25b   : > { %s523_s28 = spop %522 }
 0x25c   : > { %s406_s30 = smul.f32 0.4, %s523_s28 }
 0x25e   : > { %s407_s3 = sadd.f32 %s406_s30, %s393_s29 }
 0x260   : > { %s408_s7 = smul.f32 -2.0, %s407_s3 }
 0x262   : > { %v409_v37 = vstv %s408_s7 }
 0x263   : > { %410 = vst [vmem:[%s208_s6] sm:$0x1] %v409_v37 }
 0x264 PF: > { %s18_s14 = sadd.s32 1, %s704_s14   ;;  %s858_s9 = smov %s688_s10 }
 0x265   : > { %p15_p0 = scmp.ge.s32.totalorder %s18_s14, 4   ;;  %s859_s10 = smov %s692_s11 }
 0x266   : > { %s860_s11 = smov %s771_s21  ;;  %s861_s12 = smov %s700_s13 }
 0x267   : > { %s862_s13 = smov %s864_s16  ;;  %17 = sbr.rel (!%p15_p0) target bundleno = 6 (0x6), region = 89 }
 0x26c   :  { %428 = vsyncpa [#allocation8], 1 }
 0x26d   :  { %430 = vsyncpa [#allocation8 + $0x1], 1 }
 0x26e   :  { %431 = vsyncpa [#allocation10], 1 }
 0x26f   :  { %433 = vsyncpa [#allocation10 + $0x1], 1 }

</bundles_post_ra>
